<compile_context>
chip_gen: v6e
topology: v6e:2x2x1
jax: 0.10.0
libtpu: 0.0.40
codegen_flags: <defaults>
</compile_context>

<pallas_src>
import functools

import jax
import jax.numpy as jnp
from jax.experimental import pallas as pl
from jax.experimental.pallas import tpu as pltpu

LANE = 128     # lane width: feature dims padded to multiples of this
SUBLANE = 8    # f32 sublane packing: batch tiles are multiples of this


def _round_up(x, m):
    return (x + m - 1) // m * m


def _vmem_ceiling_bytes():
    """~85% of this generation's physical VMEM; conservative fallback fits v7x (64 MiB)."""
    try:
        cap = getattr(pltpu.get_tpu_info(), "vmem_capacity_bytes", None)
        if cap:
            return int(cap * 0.85)
    except Exception:
        pass
    return 48 << 20


def _pick_tm(B, max_dim_pad):
    """Batch-tile size: multiple of 8, >=2 grid steps when it helps megacore, VMEM-aware."""
    if B <= SUBLANE:
        return _round_up(B, SUBLANE)
    if B < 256:
        # >=2 batch tiles so dimension_semantics=("parallel",) can shard across both
        # TensorCores on v7x (each TC keeps its own single-buffered weight copy).
        return _round_up(pl.cdiv(B, 2), SUBLANE)
    # Large batch: weights are resident, so bigger tiles just amortize the ~0.35us/step
    # overhead. Stop growing when the widest live activation (tm x max_dim_pad f32)
    # would exceed ~512 KiB (vreg-spill territory) or we'd drop below 2 grid steps.
    tm = 512
    while tm > 128 and (tm * max_dim_pad * 4 > (512 << 10) or B < 2 * tm):
        tm //= 2
    return tm


def _mlp_fused_kernel(*refs, n_hidden):
    """Fused forward for one batch tile.

    refs = (x_ref, w0, b0, w1, b1, ..., wH, bH, logits_ref, feats_ref)
    Hidden blocks: h = ReLU(h @ W_l + b_l)   (Dropout == identity, eval mode)
    Head:          logits = h @ W_H + b_H
    Weights are bf16; accumulation, bias add and ReLU are f32.
    """
    x_ref = refs[0]
    logits_ref, feats_ref = refs[-2], refs[-1]
    wb = refs[1:-2]

    h = x_ref[...]
    for l in range(n_hidden):
        w_ref, b_ref = wb[2 * l], wb[2 * l + 1]
        y = jnp.dot(h.astype(jnp.bfloat16), w_ref[...],
                    preferred_element_type=jnp.float32) + b_ref[...]
        h = jnp.maximum(y, 0.0)
    feats_ref[...] = h.astype(feats_ref.dtype)

    w_ref, b_ref = wb[2 * n_hidden], wb[2 * n_hidden + 1]
    logits = jnp.dot(h.astype(jnp.bfloat16), w_ref[...],
                     preferred_element_type=jnp.float32) + b_ref[...]
    logits_ref[...] = logits.astype(logits_ref.dtype)


def mlp_forward_pallas(x, padded_wb, d_out, d_feat):
    """x: (B, d_in) f32.  padded_wb: [(w_pad bf16 (di_p, do_p), b_pad f32 (1, do_p)), ...]."""
    B, d_in = x.shape
    n_hidden = len(padded_wb) - 1
    d_in_pad = padded_wb[0][0].shape[0]
    d_feat_pad = padded_wb[n_hidden][0].shape[0]
    d_out_pad = padded_wb[n_hidden][0].shape[1]
    max_dim_pad = max([d_in_pad, d_out_pad] + [w.shape[1] for w, _ in padded_wb])

    tm = _pick_tm(B, max_dim_pad)
    B_pad = _round_up(B, tm)

    # Skip the wrapper-side pad copy when shapes already match (full HBM read+write).
    if B_pad == B and d_in == d_in_pad:
        x_pad = x
    else:
        x_pad = jnp.zeros((B_pad, d_in_pad), x.dtype).at[:B, :d_in].set(x)

    in_specs = [pl.BlockSpec((tm, d_in_pad), lambda i: (i, 0))]
    operands = [x_pad]
    single = pl.Buffered(buffer_count=1)  # grid-invariant -> no double-buffering
    for w, b in padded_wb:
        in_specs.append(pl.BlockSpec(w.shape, lambda i: (0, 0), pipeline_mode=single))
        in_specs.append(pl.BlockSpec(b.shape, lambda i: (0, 0), pipeline_mode=single))
        operands.append(w)
        operands.append(b)

    out_shape = (
        jax.ShapeDtypeStruct((B_pad, d_out_pad), x.dtype),
        jax.ShapeDtypeStruct((B_pad, d_feat_pad), x.dtype),
    )
    out_specs = (
        pl.BlockSpec((tm, d_out_pad), lambda i: (i, 0)),
        pl.BlockSpec((tm, d_feat_pad), lambda i: (i, 0)),
    )

    # VMEM budget: weights once (single-buffered), streamed tiles x2 (double-buffered),
    # widest live activation for spill headroom, plus compiler scratch.
    ceiling = _vmem_ceiling_bytes()
    wb_bytes = sum(w.size * w.dtype.itemsize + b.size * b.dtype.itemsize
                   for w, b in padded_wb)
    if wb_bytes > ceiling // 2:
        # TODO(synk): K/N-tiled streamed-weight path for very wide layers.
        raise NotImplementedError(
            "Layer weights too large for whole-weight VMEM residency on this TPU.")
    stream_bytes = 2 * tm * d_in_pad * x.dtype.itemsize            # x tile
    stream_bytes += 2 * tm * (d_out_pad + d_feat_pad) * 4          # output tiles
    act_bytes = tm * max_dim_pad * 4                                # widest live h
    vmem_limit = min(max(wb_bytes + stream_bytes + act_bytes + (2 << 20), 16 << 20),
                     ceiling)

    kernel = functools.partial(_mlp_fused_kernel, n_hidden=n_hidden)
    logits_pad, feats_pad = pl.pallas_call(
        kernel,
        grid=(B_pad // tm,),
        in_specs=in_specs,
        out_specs=out_specs,
        out_shape=out_shape,
        compiler_params=pltpu.CompilerParams(
            dimension_semantics=("parallel",),   # batch tiles -> both TCs on v7x
            vmem_limit_bytes=vmem_limit,
        ),
    )(*operands)

    logits = logits_pad if (B_pad == B and d_out == d_out_pad) \
        else logits_pad[:B, :d_out]
    feats = feats_pad if (B_pad == B and d_feat == d_feat_pad) \
        else feats_pad[:B, :d_feat]
    return logits, feats


class MLPPallas:
    """Mirror of the PyTorch MLP forward: returns (logits, features)."""

    def __init__(self, d_in, d_layers, d_out, key):
        self.d_in = d_in
        self.d_layers = list(d_layers)
        self.d_out = d_out
        self.d_feat = d_layers[-1] if d_layers else d_in

        dims = [d_in] + list(d_layers) + [d_out]
        self.unpadded = []   # kernel-layout (d_in, d_out) f32 weights, for reference check
        self.padded_wb = []  # lane-padded bf16 weights + f32 biases (kernel-ready)
        for i in range(len(dims) - 1):
            key, kw, kb = jax.random.split(key, 3)
            fan_in, fan_out = dims[i], dims[i + 1]
            bound = 1.0 / (fan_in ** 0.5)
            # PyTorch nn.Linear weight is (d_out, d_in); store transposed (d_in, d_out).
            w = jax.random.uniform(kw, (fan_in, fan_out),
                                   minval=-bound, maxval=bound, dtype=jnp.float32)
            b = jax.random.uniform(kb, (fan_out,),
                                   minval=-bound, maxval=bound, dtype=jnp.float32)
            self.unpadded.append((w, b))

            fi_p = _round_up(fan_in, LANE)
            fo_p = _round_up(fan_out, LANE)
            w_pad = (jnp.zeros((fi_p, fo_p), jnp.float32)
                     .at[:fan_in, :fan_out].set(w).astype(jnp.bfloat16))
            b_pad = jnp.zeros((1, fo_p), jnp.float32).at[0, :fan_out].set(b)
            self.padded_wb.append((w_pad, b_pad))

    def __call__(self, x):
        return mlp_forward_pallas(x, self.padded_wb, self.d_out, self.d_feat)


if __name__ == "__main__":
    key = jax.random.PRNGKey(0)
    key, kx, kp = jax.random.split(key, 3)

    # Small shapes consistent with the module's forward: x is (batch, d_in).
    batch, d_in = 8, 32
    d_layers = [64, 64]
    d_out = 8

    x = jax.random.normal(kx, (batch, d_in), dtype=jnp.float32)
    model = MLPPallas(d_in, d_layers, d_out, kp)

    logits, features = model(x)
    jax.block_until_ready((logits, features))

    # Reference check in plain JAX (same math: bf16 weights/inputs to the matmul,
    # f32 accumulation, f32 bias + ReLU; eval-mode dropout = identity).
    ref_f = x
    for w, b in model.unpadded[:-1]:
        ref_f = jnp.maximum(
            jnp.dot(ref_f.astype(jnp.bfloat16), w.astype(jnp.bfloat16),
                    preferred_element_type=jnp.float32) + b, 0.0)
    head_w, head_b = model.unpadded[-1]
    ref_logits = jnp.dot(ref_f.astype(jnp.bfloat16), head_w.astype(jnp.bfloat16),
                         preferred_element_type=jnp.float32) + head_b

    assert logits.shape == (batch, d_out)
    assert features.shape == (batch, d_layers[-1])
    assert jnp.allclose(logits, ref_logits, atol=1e-4)
    assert jnp.allclose(features, ref_f, atol=1e-4)

    print("KERNEL_OK")
</pallas_src>

<mosaic_0001>
module attributes {stable_mosaic.version = 11 : i64} {
  func.func @_mlp_fused_kernel(%arg0: i32, %arg1: memref<8x128xf32, #tpu.memory_space<vmem>>, %arg2: memref<128x128xbf16, #tpu.memory_space<vmem>>, %arg3: memref<1x128xf32, #tpu.memory_space<vmem>>, %arg4: memref<128x128xbf16, #tpu.memory_space<vmem>>, %arg5: memref<1x128xf32, #tpu.memory_space<vmem>>, %arg6: memref<128x128xbf16, #tpu.memory_space<vmem>>, %arg7: memref<1x128xf32, #tpu.memory_space<vmem>>, %arg8: memref<8x128xf32, #tpu.memory_space<vmem>>, %arg9: memref<8x128xf32, #tpu.memory_space<vmem>>) attributes {dimension_semantics = [#tpu.dimension_semantics<parallel>], iteration_bounds = array<i64: 1>, scalar_prefetch = 0 : i64, scratch_operands = 0 : i64, tpu.core_type = #tpu.core_type<tc>, window_params = [{transform_indices = @transform_0, window_bounds = array<i64: 8, 128>}, {pipeline_mode = #tpu.pipeline_mode<synchronous>, transform_indices = @transform_1, window_bounds = array<i64: 128, 128>}, {pipeline_mode = #tpu.pipeline_mode<synchronous>, transform_indices = @transform_2, window_bounds = array<i64: 1, 128>}, {pipeline_mode = #tpu.pipeline_mode<synchronous>, transform_indices = @transform_3, window_bounds = array<i64: 128, 128>}, {pipeline_mode = #tpu.pipeline_mode<synchronous>, transform_indices = @transform_4, window_bounds = array<i64: 1, 128>}, {pipeline_mode = #tpu.pipeline_mode<synchronous>, transform_indices = @transform_5, window_bounds = array<i64: 128, 128>}, {pipeline_mode = #tpu.pipeline_mode<synchronous>, transform_indices = @transform_6, window_bounds = array<i64: 1, 128>}, {transform_indices = @transform_7, window_bounds = array<i64: 8, 128>}, {transform_indices = @transform_8, window_bounds = array<i64: 8, 128>}]} {
    %c0 = arith.constant 0 : index
    %c0_0 = arith.constant 0 : index
    %0 = vector.load %arg1[%c0, %c0_0] : memref<8x128xf32, #tpu.memory_space<vmem>>, vector<8x128xf32>
    %1 = arith.truncf %0 : vector<8x128xf32> to vector<8x128xbf16>
    %c0_1 = arith.constant 0 : index
    %c0_2 = arith.constant 0 : index
    %2 = vector.load %arg2[%c0_1, %c0_2] : memref<128x128xbf16, #tpu.memory_space<vmem>>, vector<128x128xbf16>
    %cst = arith.constant dense<0.000000e+00> : vector<8x128xf32>
    %3 = tpu.matmul %1, %2, %cst {dimension_numbers = #tpu.dot_dimension_numbers<[1], [0], [0], [1], [0, 0, 1, 1], [], []>} : vector<8x128xbf16>, vector<128x128xbf16>, vector<8x128xf32> -> vector<8x128xf32>
    %c0_3 = arith.constant 0 : index
    %c0_4 = arith.constant 0 : index
    %4 = vector.load %arg3[%c0_3, %c0_4] : memref<1x128xf32, #tpu.memory_space<vmem>>, vector<1x128xf32>
    %5 = vector.broadcast %4 : vector<1x128xf32> to vector<8x128xf32>
    %6 = arith.addf %3, %5 : vector<8x128xf32>
    %cst_5 = arith.constant 0.000000e+00 : f32
    %7 = vector.broadcast %cst_5 : f32 to vector<8x128xf32>
    %8 = arith.maximumf %6, %7 : vector<8x128xf32>
    %9 = arith.truncf %8 : vector<8x128xf32> to vector<8x128xbf16>
    %c0_6 = arith.constant 0 : index
    %c0_7 = arith.constant 0 : index
    %10 = vector.load %arg4[%c0_6, %c0_7] : memref<128x128xbf16, #tpu.memory_space<vmem>>, vector<128x128xbf16>
    %cst_8 = arith.constant dense<0.000000e+00> : vector<8x128xf32>
    %11 = tpu.matmul %9, %10, %cst_8 {dimension_numbers = #tpu.dot_dimension_numbers<[1], [0], [0], [1], [0, 0, 1, 1], [], []>} : vector<8x128xbf16>, vector<128x128xbf16>, vector<8x128xf32> -> vector<8x128xf32>
    %c0_9 = arith.constant 0 : index
    %c0_10 = arith.constant 0 : index
    %12 = vector.load %arg5[%c0_9, %c0_10] : memref<1x128xf32, #tpu.memory_space<vmem>>, vector<1x128xf32>
    %13 = vector.broadcast %12 : vector<1x128xf32> to vector<8x128xf32>
    %14 = arith.addf %11, %13 : vector<8x128xf32>
    %cst_11 = arith.constant 0.000000e+00 : f32
    %15 = vector.broadcast %cst_11 : f32 to vector<8x128xf32>
    %16 = arith.maximumf %14, %15 : vector<8x128xf32>
    %c0_12 = arith.constant 0 : index
    %c0_13 = arith.constant 0 : index
    %17 = vector.load %arg9[%c0_12, %c0_13] : memref<8x128xf32, #tpu.memory_space<vmem>>, vector<8x128xf32>
    tpu.vector_store %arg9[%c0_12, %c0_13], %16 {strides = array<i32>} : memref<8x128xf32, #tpu.memory_space<vmem>>, vector<8x128xf32>,
    %18 = arith.truncf %16 : vector<8x128xf32> to vector<8x128xbf16>
    %c0_14 = arith.constant 0 : index
    %c0_15 = arith.constant 0 : index
    %19 = vector.load %arg6[%c0_14, %c0_15] : memref<128x128xbf16, #tpu.memory_space<vmem>>, vector<128x128xbf16>
    %cst_16 = arith.constant dense<0.000000e+00> : vector<8x128xf32>
    %20 = tpu.matmul %18, %19, %cst_16 {dimension_numbers = #tpu.dot_dimension_numbers<[1], [0], [0], [1], [0, 0, 1, 1], [], []>} : vector<8x128xbf16>, vector<128x128xbf16>, vector<8x128xf32> -> vector<8x128xf32>
    %c0_17 = arith.constant 0 : index
    %c0_18 = arith.constant 0 : index
    %21 = vector.load %arg7[%c0_17, %c0_18] : memref<1x128xf32, #tpu.memory_space<vmem>>, vector<1x128xf32>
    %22 = vector.broadcast %21 : vector<1x128xf32> to vector<8x128xf32>
    %23 = arith.addf %20, %22 : vector<8x128xf32>
    %c0_19 = arith.constant 0 : index
    %c0_20 = arith.constant 0 : index
    %24 = vector.load %arg8[%c0_19, %c0_20] : memref<8x128xf32, #tpu.memory_space<vmem>>, vector<8x128xf32>
    tpu.vector_store %arg8[%c0_19, %c0_20], %23 {strides = array<i32>} : memref<8x128xf32, #tpu.memory_space<vmem>>, vector<8x128xf32>,
    return
  }
  func.func @transform_0(%arg0: i32) -> (i32, i32) {
    %c0_i32 = arith.constant 0 : i32
    %c0_i32_0 = arith.constant 0 : i32
    return %arg0, %c0_i32 : i32, i32
  }
  func.func @transform_1(%arg0: i32) -> (i32, i32) {
    %c0_i32 = arith.constant 0 : i32
    %c0_i32_0 = arith.constant 0 : i32
    %c0_i32_1 = arith.constant 0 : i32
    return %c0_i32, %c0_i32_0 : i32, i32
  }
  func.func @transform_2(%arg0: i32) -> (i32, i32) {
    %c0_i32 = arith.constant 0 : i32
    %c0_i32_0 = arith.constant 0 : i32
    %c0_i32_1 = arith.constant 0 : i32
    return %c0_i32, %c0_i32_0 : i32, i32
  }
  func.func @transform_3(%arg0: i32) -> (i32, i32) {
    %c0_i32 = arith.constant 0 : i32
    %c0_i32_0 = arith.constant 0 : i32
    %c0_i32_1 = arith.constant 0 : i32
    return %c0_i32, %c0_i32_0 : i32, i32
  }
  func.func @transform_4(%arg0: i32) -> (i32, i32) {
    %c0_i32 = arith.constant 0 : i32
    %c0_i32_0 = arith.constant 0 : i32
    %c0_i32_1 = arith.constant 0 : i32
    return %c0_i32, %c0_i32_0 : i32, i32
  }
  func.func @transform_5(%arg0: i32) -> (i32, i32) {
    %c0_i32 = arith.constant 0 : i32
    %c0_i32_0 = arith.constant 0 : i32
    %c0_i32_1 = arith.constant 0 : i32
    return %c0_i32, %c0_i32_0 : i32, i32
  }
  func.func @transform_6(%arg0: i32) -> (i32, i32) {
    %c0_i32 = arith.constant 0 : i32
    %c0_i32_0 = arith.constant 0 : i32
    %c0_i32_1 = arith.constant 0 : i32
    return %c0_i32, %c0_i32_0 : i32, i32
  }
  func.func @transform_7(%arg0: i32) -> (i32, i32) {
    %c0_i32 = arith.constant 0 : i32
    %c0_i32_0 = arith.constant 0 : i32
    return %arg0, %c0_i32 : i32, i32
  }
  func.func @transform_8(%arg0: i32) -> (i32, i32) {
    %c0_i32 = arith.constant 0 : i32
    %c0_i32_0 = arith.constant 0 : i32
    return %arg0, %c0_i32 : i32, i32
  }
}

</mosaic_0001>

<bundles_post_ra>
// kernel: tpu_custom_call.1
= control target key start
LH: loop header
LB: loop body
LE: loop exit
PB: predicated region body
PF: predicated region fallthrough
CT: control target
= control target key end

     0   :  { %14 = vsyncpa [#allocation3], 0  ;;  %s855_s0 = inlined_call_operand.hbm [shape: f32[8,128], index: 0, kind: input, shape index: {}]   ;;  %s856_s1 = inlined_call_operand.hbm [shape: bf16[128,128], index: 1, kind: input, shape index: {}]   ;;  %s857_s2 = inlined_call_operand.vmem [shape: f32[1,128], index: 2, kind: input, shape index: {}]   ;;  %s858_s3 = inlined_call_operand.hbm [shape: bf16[128,128], index: 3, kind: input, shape index: {}]   ;;  %s859_s4 = inlined_call_operand.vmem [shape: f32[1,128], index: 4, kind: input, shape index: {}]   ;;  %s860_s5 = inlined_call_operand.hbm [shape: bf16[128,128], index: 5, kind: input, shape index: {}]   ;;  %s861_s6 = inlined_call_operand.vmem [shape: f32[1,128], index: 6, kind: input, shape index: {}]   ;;  %s862_s7 = inlined_call_operand.hbm [shape: f32[8,128], index: 7, kind: output, shape index: {0}]   ;;  %s863_s8 = inlined_call_operand.hbm [shape: f32[8,128], index: 8, kind: output, shape index: {1}]  }
   0x1   :  { %15 = vsyncpa [#allocation6], 0 }
   0x2   :  { %16 = vsyncpa [#allocation9], 0 }
   0x3   :  { %17 = vsyncpa [#allocation4], 0 }
   0x4   :  { %18 = vsyncpa [#allocation12], 0  ;;  %s734_s27 = smov [#allocation5]  }
   0x5   :  { %s34_s28 = sshll.u32 %s734_s27, 4  ;;  %s35_s28 = int_to_ptr.vmem [resolvable:$true] %s34_s28 }
   0x6   :  { %s612_s29 = scalar_lea.vmem %s35_s28, 1024  ;;  %p617_p1 = scmp.lt.s32.totalorder %s35_s28, %s35_s28 }
   0x7   :  { %p613_p0 = scmp.ne.s32.totalorder %s35_s28, %s612_s29  ;;  %p618_p2 = scmp.lt.s32.totalorder %s612_s29, %s612_s29 }
   0x9   :  { %p619_p3 = por %p618_p2, %p617_p1 }
   0xb   :  { %p620_p4 = pnand %p619_p3, %p613_p0 }
   0xd   :  { %623 = shalt.err (!%p620_p4)
}
   0xe   :  { %s735_s30 = smov 64   ;;  %s736_s9 = smov 4  }
   0xf   :  { %40 = dma.hbm_to_vmem [thread:$0]  %s856_s1, 1024, %s35_s28, [#allocation6], %s735_s30, %s735_s30, %s736_s9  }
  0x10   :  { %s737_s12 = smov [#allocation2]   ;;  %s738_s14 = smov [#allocation7]  }
  0x11   :  { %s25_s13 = sshll.u32 %s737_s12, 4  ;;  %s48_s15 = sshll.u32 %s738_s14, 4  ;;  %s26_s13 = int_to_ptr.vmem [resolvable:$true] %s25_s13  ;;  %s49_s15 = int_to_ptr.vmem [resolvable:$true] %s48_s15 }
  0x12   :  { %s632_s16 = scalar_lea.vmem %s26_s13, 128  ;;  %p637_p6 = scmp.lt.s32.totalorder %s26_s13, %s26_s13 }
  0x13   :  { %p633_p5 = scmp.ne.s32.totalorder %s26_s13, %s632_s16  ;;  %p638_p7 = scmp.lt.s32.totalorder %s632_s16, %s632_s16 }
  0x15   :  { %p639_p8 = por %p638_p7, %p637_p6 }
  0x17   :  { %p640_p9 = pnand %p639_p8, %p633_p5 }
  0x19   :  { %643 = shalt.err (!%p640_p9)
}
  0x1a   :  { %28 = dma.hbm_to_vmem [thread:$0]  %s855_s0, 128, %s26_s13, [#allocation3]  }
  0x1b   :  { %s652_s19 = scalar_lea.vmem %s49_s15, 1024  ;;  %p657_p11 = scmp.lt.s32.totalorder %s49_s15, %s49_s15 }
  0x1c   :  { %p653_p10 = scmp.ne.s32.totalorder %s49_s15, %s652_s19  ;;  %p658_p12 = scmp.lt.s32.totalorder %s652_s19, %s652_s19 }
  0x1e   :  { %p659_p13 = por %p658_p12, %p657_p11 }
  0x20   :  { %p660_p0 = pnand %p659_p13, %p653_p10 }
  0x22   :  { %663 = shalt.err (!%p660_p0)
}
  0x23   :  { %54 = dma.hbm_to_vmem [thread:$0]  %s858_s3, 1024, %s49_s15, [#allocation6], %s735_s30, %s735_s30, %s736_s9  }
  0x24   :  { %s739_s21 = smov [#allocation8]  }
  0x25   :  { %s62_s22 = sshll.u32 %s739_s21, 4  ;;  %s63_s22 = int_to_ptr.vmem [resolvable:$true] %s62_s22 }
  0x26   :  { %s672_s23 = scalar_lea.vmem %s63_s22, 1024  ;;  %p677_p2 = scmp.lt.s32.totalorder %s63_s22, %s63_s22 }
  0x27   :  { %p673_p1 = scmp.ne.s32.totalorder %s63_s22, %s672_s23  ;;  %p678_p3 = scmp.lt.s32.totalorder %s672_s23, %s672_s23 }
  0x29   :  { %p679_p4 = por %p678_p3, %p677_p2 }
  0x2b   :  { %p680_p5 = pnand %p679_p4, %p673_p1 }
  0x2d   :  { %683 = shalt.err (!%p680_p5)
}
  0x2e   :  { %68 = dma.hbm_to_vmem [thread:$0]  %s860_s5, 1024, %s63_s22, [#allocation9], %s735_s30, %s735_s30, %s736_s9  }
  0x2f   :  { %724 = dma.done.wait [#allocation3], 128  }
  0x30   :  { %725 = vsyncadd [#allocation3], 4294967168 }
  0x31   :  { %726 = dma.done.wait [#allocation6], 2048  }
  0x32   :  { %727 = vsyncadd [#allocation6], 4294965248 }
  0x33   :  { %728 = dma.done.wait [#allocation9], 1024  }
  0x34   :  { %729 = vsyncadd [#allocation9], 4294966272  ;;  %v740_v0 = vmov 0.0   ;;  %vm741_vm0 = vmmov 0   ;;  %v580_v1 = vld [vmem:[#allocation5 + $0x38] sm:$0xff]   ;;  %v581_v2 = vld [vmem:[#allocation5 + $0x30] sm:$0xff]  }
  0x35   :  { %510 = vmatprep.subr.bf16.mxu0 %v740_v0  ;;  %526 = vmatprep.mubr.msk.bf16.mxu0 %vm741_vm0, %v740_v0  ;;  %v582_v3 = vld [vmem:[#allocation5 + $0x28] sm:$0xff]   ;;  %v588_v4 = vld [vmem:[#allocation7 + $0x38] sm:$0xff]   ;;  %v583_v5 = vld [vmem:[#allocation5 + $0x20] sm:$0xff]  }
  0x36   :  { %530 = vmatprep.subr.bf16.mxu1 %v740_v0  ;;  %546 = vmatprep.mubr.msk.bf16.mxu1 %vm741_vm0, %v740_v0  ;;  %v589_v6 = vld [vmem:[#allocation7 + $0x30] sm:$0xff]   ;;  %v584_v7 = vld [vmem:[#allocation5 + $0x18] sm:$0xff]   ;;  %v590_v8 = vld [vmem:[#allocation7 + $0x28] sm:$0xff]  }
  0x37   :  { %511 = vmatpush3.bf16.msra.mxu0 %v580_v1  ;;  %531 = vmatpush3.bf16.msra.mxu1 %v588_v4  ;;  %v585_v9 = vld [vmem:[#allocation5 + $0x10] sm:$0xff]   ;;  %v591_v10 = vld [vmem:[#allocation7 + $0x20] sm:$0xff]   ;;  %v586_v11 = vld [vmem:[#allocation5 + $0x8] sm:$0xff]  }
  0x38   :  { %512 = vmatprep.subr.bf16.mxu0 %v740_v0  ;;  %532 = vmatprep.subr.bf16.mxu1 %v740_v0  ;;  %v592_v12 = vld [vmem:[#allocation7 + $0x18] sm:$0xff]   ;;  %v587_v13 = vld [vmem:[#allocation5] sm:$0xff]   ;;  %v593_v15 = vld [vmem:[#allocation7 + $0x10] sm:$0xff]  }
  0x39   :  { %v84_v14 = vld [vmem:[#allocation2] sm:$0xff]  ;;  %v594_v17 = vld [vmem:[#allocation7 + $0x8] sm:$0xff]   ;;  %v595_v18 = vld [vmem:[#allocation7] sm:$0xff]  }
  0x3a   :  { %v85_v16 = vpack.c.bf16 %v84_v14, %v84_v14  ;;  %v596_v19 = vld [vmem:[#allocation8 + $0x38] sm:$0xff]   ;;  %v597_v20 = vld [vmem:[#allocation8 + $0x30] sm:$0xff]   ;;  %v598_v21 = vld [vmem:[#allocation8 + $0x28] sm:$0xff]  }
  0x3b   :  { %513 = vmatpush3.bf16.msra.mxu0 %v581_v2  ;;  %533 = vmatpush3.bf16.msra.mxu1 %v589_v6  ;;  %v599_v22 = vld [vmem:[#allocation8 + $0x20] sm:$0xff]   ;;  %v600_v23 = vld [vmem:[#allocation8 + $0x18] sm:$0xff]   ;;  %v601_v24 = vld [vmem:[#allocation8 + $0x10] sm:$0xff]  }
  0x3c   :  { %514 = vmatprep.subr.bf16.mxu0 %v740_v0  ;;  %534 = vmatprep.subr.bf16.mxu1 %v740_v0  ;;  %v456_v25 = vld [vmem:[%s857_s2] ss:$0 sm:$0xff]  ;;  %v602_v33 = vld [vmem:[#allocation8 + $0x8] sm:$0xff]   ;;  %v603_v34 = vld [vmem:[#allocation8] sm:$0xff]   ;;  %s742_s2 = smov [#allocation11]  }
  0x3d   :  { %v465_v35 = vld [vmem:[%s859_s4] ss:$0 sm:$0xff]  ;;  %s441_s27 = sshll.u32 %s742_s2, 4  ;;  %s442_s27 = int_to_ptr.vmem [resolvable:$true] %s441_s27 }
  0x3e   :  { %s684_s28 = scalar_lea.vmem %s442_s27, 128  ;;  %p689_p7 = scmp.lt.s32.totalorder %s442_s27, %s442_s27 }
  0x3f   :  { %515 = vmatpush3.bf16.msra.mxu0 %v582_v3  ;;  %535 = vmatpush3.bf16.msra.mxu1 %v590_v8  ;;  %p685_p6 = scmp.ne.s32.totalorder %s442_s27, %s684_s28  ;;  %p690_p8 = scmp.lt.s32.totalorder %s684_s28, %s684_s28 }
  0x40   :  { %516 = vmatprep.subr.bf16.mxu0 %v740_v0  ;;  %536 = vmatprep.subr.bf16.mxu1 %v740_v0 }
  0x41   :  { %p691_p9 = por %p690_p8, %p689_p7 }
  0x43   :  { %517 = vmatpush3.bf16.msra.mxu0 %v583_v5  ;;  %537 = vmatpush3.bf16.msra.mxu1 %v591_v10  ;;  %p692_p10 = pnand %p691_p9, %p685_p6 }
  0x44   :  { %518 = vmatprep.subr.bf16.mxu0 %v740_v0  ;;  %538 = vmatprep.subr.bf16.mxu1 %v740_v0 }
  0x47   :  { %519 = vmatpush3.bf16.msra.mxu0 %v584_v7  ;;  %539 = vmatpush3.bf16.msra.mxu1 %v592_v12 }
  0x48   :  { %520 = vmatprep.subr.bf16.mxu0 %v740_v0  ;;  %540 = vmatprep.subr.bf16.mxu1 %v740_v0 }
  0x4b   :  { %521 = vmatpush3.bf16.msra.mxu0 %v585_v9  ;;  %541 = vmatpush3.bf16.msra.mxu1 %v593_v15 }
  0x4c   :  { %522 = vmatprep.subr.bf16.mxu0 %v740_v0  ;;  %542 = vmatprep.subr.bf16.mxu1 %v740_v0 }
  0x4f   :  { %523 = vmatpush3.bf16.msra.mxu0 %v586_v11  ;;  %543 = vmatpush3.bf16.msra.mxu1 %v594_v17 }
  0x50   :  { %524 = vmatprep.subr.bf16.mxu0 %v740_v0  ;;  %544 = vmatprep.subr.bf16.mxu1 %v740_v0 }
  0x53   :  { %525 = vmatpush3.bf16.msra.mxu0 %v587_v13  ;;  %545 = vmatpush3.bf16.msra.mxu1 %v595_v18 }
  0x54   :  { %550 = vmatprep.subr.bf16.mxu0 %v740_v0 }
  0x56   :  { %527 = vmatmul.mubr.bf16.vlgmr.msra.gmra.mxu0 %v85_v16 }
  0x57   :  { %566 = vmatprep.mubr.msk.bf16.mxu0 %vm741_vm0, %v740_v0  ;;  %551 = vmatpush3.bf16.msra.mxu0 %v596_v19 }
  0x58   :  { %552 = vmatprep.subr.bf16.mxu0 %v740_v0 }
  0x5b   :  { %553 = vmatpush3.bf16.msra.mxu0 %v597_v20 }
  0x5c   :  { %554 = vmatprep.subr.bf16.mxu0 %v740_v0 }
  0x5f   :  { %555 = vmatpush3.bf16.msra.mxu0 %v598_v21 }
  0x60   :  { %556 = vmatprep.subr.bf16.mxu0 %v740_v0 }
  0x63   :  { %557 = vmatpush3.bf16.msra.mxu0 %v599_v22 }
  0x64   :  { %558 = vmatprep.subr.bf16.mxu0 %v740_v0 }
  0x67   :  { %559 = vmatpush3.bf16.msra.mxu0 %v600_v23 }
  0x68   :  { %560 = vmatprep.subr.bf16.mxu0 %v740_v0 }
  0x6b   :  { %561 = vmatpush3.bf16.msra.mxu0 %v601_v24 }
  0x6c   :  { %562 = vmatprep.subr.bf16.mxu0 %v740_v0 }
  0x6f   :  { %563 = vmatpush3.bf16.msra.mxu0 %v602_v33 }
  0x70   :  { %564 = vmatprep.subr.bf16.mxu0 %v740_v0 }
  0x73   :  { %565 = vmatpush3.bf16.msra.mxu0 %v603_v34 }
 0x116   :  { %v191_v26 = vpop.f32.mrf.mxu0 }
 0x117   :  { %v192_v27 = vadd.f32 %v456_v25, %v191_v26 }
 0x118   :  { %v528_v28 = vpop.f32.mrf.mxu0 }
 0x119   :  { %v197_v29 = vmax.f32 %v192_v27, 0.0 }
 0x11a   :  { %v194_v30 = vpop.f32.mrf.mxu0 }
 0x11b   :  { %v198_v31 = vpack.c.bf16 %v197_v29, %v197_v29 }
 0x11c   :  { %v529_v32 = vpop.f32.mrf.mxu0 }
 0x11d   :  { %547 = vmatmul.mubr.bf16.vlgmr.msra.gmra.mxu1 %v198_v31 }
 0x1dd   :  { %v304_v36 = vpop.f32.mrf.mxu1 }
 0x1de   :  { %v305_v37 = vadd.f32 %v465_v35, %v304_v36 }
 0x1df   :  { %v548_v38 = vpop.f32.mrf.mxu1 }
 0x1e0   :  { %v310_v39 = vmax.f32 %v305_v37, 0.0 }
 0x1e1   :  { %v307_v40 = vpop.f32.mrf.mxu1 }
 0x1e2   :  { %v312_v41 = vpack.c.bf16 %v310_v39, %v310_v39  ;;  %311 = vst [vmem:[#allocation11] sm:$0xff] %v310_v39 }
 0x1e3   :  { %v549_v42 = vpop.f32.mrf.mxu1 }
 0x1e4   :  { %567 = vmatmul.mubr.bf16.vlgmr.msra.gmra.mxu0 %v312_v41 }
 0x1e5   :  { %695 = shalt.err (!%p692_p10)
}
 0x1e6   :  { %444 = dma.vmem_to_hbm [thread:$0]  %s442_s27, 128, %s863_s8, [#allocation12]   ;;  %v474_v43 = vld [vmem:[%s861_s6] ss:$0 sm:$0xff] }
 0x1e7   :  { %s743_s10 = smov [#allocation10]  }
 0x1e8   :  { %s431_s11 = sshll.u32 %s743_s10, 4  ;;  %s432_s11 = int_to_ptr.vmem [resolvable:$true] %s431_s11 }
 0x1e9   :  { %s704_s12 = scalar_lea.vmem %s432_s11, 128  ;;  %p709_p12 = scmp.lt.s32.totalorder %s432_s11, %s432_s11 }
 0x1ea   :  { %p705_p11 = scmp.ne.s32.totalorder %s432_s11, %s704_s12  ;;  %p710_p13 = scmp.lt.s32.totalorder %s704_s12, %s704_s12 }
 0x1ec   :  { %p711_p0 = por %p710_p13, %p709_p12 }
 0x1ee   :  { %p712_p1 = pnand %p711_p0, %p705_p11 }
 0x2a4   :  { %v418_v44 = vpop.f32.mrf.mxu0 }
 0x2a5   :  { %v419_v45 = vadd.f32 %v474_v43, %v418_v44 }
 0x2a6   :  { %v568_v46 = vpop.f32.mrf.mxu0 }
 0x2a7   :  { %424 = vst [vmem:[#allocation10] sm:$0xff] %v419_v45 }
 0x2a8   :  { %v421_v47 = vpop.f32.mrf.mxu0 }
 0x2a9   :  { %715 = shalt.err (!%p712_p1)
}
 0x2aa   :  { %434 = dma.vmem_to_hbm [thread:$0]  %s432_s11, 128, %s862_s7, [#allocation4]   ;;  %v569_v48 = vpop.f32.mrf.mxu0 }
 0x2ab   :  { %730 = dma.done.wait [#allocation4], 128  }
 0x2ac   :  { %731 = vsyncadd [#allocation4], 4294967168 }
 0x2ad   :  { %732 = dma.done.wait [#allocation12], 128  }
 0x2ae   :  { %733 = vsyncadd [#allocation12], 4294967168 }
 0x2af   :  { %451 = vsyncpa [#allocation3], 1 }
 0x2b0   :  { %452 = vsyncpa [#allocation6], 1 }
 0x2b1   :  { %453 = vsyncpa [#allocation9], 1 }
 0x2b2   :  { %454 = vsyncpa [#allocation4], 1 }
 0x2b3   :  { %455 = vsyncpa [#allocation12], 1 }

</bundles_post_ra>
